<compile_context>
chip_gen: v7x
topology: tpu7x:2x2x1
jax: 0.10.0
libtpu: 0.0.40
codegen_flags: <defaults>
</compile_context>

<pallas_src>
import jax
import jax.numpy as jnp
from jax.experimental import pallas as pl
from jax.experimental.pallas import tpu as pltpu


_NEG_SLOPE = 0.01                      # nn.LeakyReLU() default negative_slope
_VMEM_TILE_BUDGET = 8 * 1024 * 1024    # per-tile budget (x2 for double buffering)
_VMEM_LIMIT = 32 * 1024 * 1024         # safe on v5e/v6e/v7x


def _round_up(x, m):
    return (x + m - 1) // m * m


# ---------------- Path A: small C -> batch on the lane axis -----------------
def _morph_head_kernel_lane_batch(x_ref, w_ref, b_ref, o_ref):
    # x_ref: (1, TB)   activations, batch on lanes
    # w_ref: (C, 1)    Linear weight
    # b_ref: (C, 1)    Linear bias
    # o_ref: (C, TB)   log-probabilities, classes on sublanes
    x = x_ref[...]
    a = jnp.where(x >= 0.0, x, _NEG_SLOPE * x)            # LeakyReLU
    logits = a * w_ref[...] + b_ref[...]                   # (C, TB) broadcast
    m = jnp.max(logits, axis=0, keepdims=True)             # reduce over classes
    z = logits - m
    lse = jnp.log(jnp.sum(jnp.exp(z), axis=0, keepdims=True))
    o_ref[...] = z - lse


# ---------------- Path B: large C -> classes on the lane axis ---------------
def _morph_head_kernel_lane_classes(x_ref, wt_ref, b_ref, o_ref):
    # x_ref: (TB, 1); wt_ref/b_ref: (1, C); o_ref: (TB, C)
    x = x_ref[...]
    a = jnp.where(x >= 0.0, x, _NEG_SLOPE * x)
    logits = a * wt_ref[...] + b_ref[...]
    m = jnp.max(logits, axis=1, keepdims=True)
    z = logits - m
    lse = jnp.log(jnp.sum(jnp.exp(z), axis=1, keepdims=True))
    o_ref[...] = z - lse


def morph_head(embedding, weight, bias):
    """embedding: (B, 1) f32; weight: (C, 1) f32; bias: (C,) f32 -> (B, C) f32."""
    embedding = embedding.astype(jnp.float32)
    B = embedding.shape[0]
    C = weight.shape[0]

    compiler_params = pltpu.CompilerParams(
        dimension_semantics=("parallel",),      # batch grid is embarrassingly parallel
        vmem_limit_bytes=_VMEM_LIMIT,
    )

    if C < 128:
        # Lane-dense output: kernel writes (C, TB) tiles with batch on lanes.
        lane_bytes = 2 * 4 * (C + 1)            # double-buffered output + x per lane
        max_tb = max(128, (_VMEM_TILE_BUDGET // lane_bytes) // 128 * 128)
        TB = min(_round_up(B, 128), max_tb, 16384)   # multiple of 128 (lane axis)
        Bp = _round_up(B, TB)
        n_tiles = Bp // TB

        x_t = jnp.pad(embedding.reshape(1, B), ((0, 0), (0, Bp - B)))  # (1, Bp)
        w2 = weight.reshape(C, 1).astype(jnp.float32)                  # (C, 1)
        b2 = bias.reshape(C, 1).astype(jnp.float32)                    # (C, 1)

        out_t = pl.pallas_call(
            _morph_head_kernel_lane_batch,
            out_shape=jax.ShapeDtypeStruct((C, Bp), jnp.float32),
            grid=(n_tiles,),
            in_specs=[
                pl.BlockSpec((1, TB), lambda i: (0, i)),   # batch tile
                pl.BlockSpec((C, 1), lambda i: (0, 0)),    # weight (resident)
                pl.BlockSpec((C, 1), lambda i: (0, 0)),    # bias   (resident)
            ],
            out_specs=pl.BlockSpec((C, TB), lambda i: (0, i)),
            compiler_params=compiler_params,
        )(x_t, w2, b2)
        return out_t.T[:B]                                  # (B, C)
    else:
        # Classes on lanes, full-C blocks, batch tiled over sublanes.
        row_bytes = 2 * 4 * (C + 1)
        max_tb = max(8, (_VMEM_TILE_BUDGET // row_bytes) // 8 * 8)
        TB = min(_round_up(B, 8), max_tb, 4096)              # multiple of 8 (sublane)
        Bp = _round_up(B, TB)
        n_tiles = Bp // TB

        x_p = jnp.pad(embedding.reshape(B, 1), ((0, Bp - B), (0, 0)))  # (Bp, 1)
        wT = weight.reshape(C, 1).T.reshape(1, C).astype(jnp.float32)  # (1, C)
        b2 = bias.reshape(1, C).astype(jnp.float32)                    # (1, C)

        out = pl.pallas_call(
            _morph_head_kernel_lane_classes,
            out_shape=jax.ShapeDtypeStruct((Bp, C), jnp.float32),
            grid=(n_tiles,),
            in_specs=[
                pl.BlockSpec((TB, 1), lambda i: (i, 0)),
                pl.BlockSpec((1, C), lambda i: (0, 0)),
                pl.BlockSpec((1, C), lambda i: (0, 0)),
            ],
            out_specs=pl.BlockSpec((TB, C), lambda i: (i, 0)),
            compiler_params=compiler_params,
        )(x_p, wT, b2)
        return out[:B]


def morph_head_ref(embedding, weight, bias):
    """Pure-JAX reference matching the PyTorch forward."""
    a = jnp.where(embedding >= 0.0, embedding, _NEG_SLOPE * embedding)
    logits = a @ weight.T + bias
    return jax.nn.log_softmax(logits, axis=1)


if __name__ == "__main__":
    key = jax.random.PRNGKey(0)
    k_x, k_w, k_b = jax.random.split(key, 3)

    # --- small-C path (module default: num_classes=2) ---
    batch, num_classes = 8, 2
    embedding = jax.random.normal(k_x, (batch, 1), dtype=jnp.float32)
    weight = jax.random.uniform(k_w, (num_classes, 1), minval=-1.0, maxval=1.0,
                                dtype=jnp.float32)
    bias = jax.random.uniform(k_b, (num_classes,), minval=-1.0, maxval=1.0,
                              dtype=jnp.float32)

    out = jax.block_until_ready(morph_head(embedding, weight, bias))
    ref = jax.block_until_ready(morph_head_ref(embedding, weight, bias))
    assert out.shape == (batch, num_classes)
    assert jnp.allclose(out, ref, atol=1e-5, rtol=1e-5), (out, ref)

    # --- large-C path (classes on lanes) ---
    batch2, num_classes2 = 24, 256
    emb2 = jax.random.normal(k_x, (batch2, 1), dtype=jnp.float32)
    w2 = jax.random.uniform(k_w, (num_classes2, 1), minval=-1.0, maxval=1.0,
                            dtype=jnp.float32)
    b2 = jax.random.uniform(k_b, (num_classes2,), minval=-1.0, maxval=1.0,
                            dtype=jnp.float32)
    out2 = jax.block_until_ready(morph_head(emb2, w2, b2))
    ref2 = jax.block_until_ready(morph_head_ref(emb2, w2, b2))
    assert out2.shape == (batch2, num_classes2)
    assert jnp.allclose(out2, ref2, atol=1e-5, rtol=1e-5)

    print("KERNEL_OK")
</pallas_src>

<mosaic_0001>
module attributes {stable_mosaic.version = 11 : i64} {
  func.func @_morph_head_kernel_lane_batch(%arg0: i32, %arg1: memref<1x128xf32, #tpu.memory_space<vmem>>, %arg2: memref<2x1xf32, #tpu.memory_space<vmem>>, %arg3: memref<2x1xf32, #tpu.memory_space<vmem>>, %arg4: memref<2x128xf32, #tpu.memory_space<vmem>>) attributes {dimension_semantics = [#tpu.dimension_semantics<parallel>], iteration_bounds = array<i64: 1>, scalar_prefetch = 0 : i64, scratch_operands = 0 : i64, tpu.core_type = #tpu.core_type<tc>, window_params = [{transform_indices = @transform_0, window_bounds = array<i64: 1, 128>}, {pipeline_mode = #tpu.pipeline_mode<synchronous>, transform_indices = @transform_1, window_bounds = array<i64: 2, 1>}, {pipeline_mode = #tpu.pipeline_mode<synchronous>, transform_indices = @transform_2, window_bounds = array<i64: 2, 1>}, {transform_indices = @transform_3, window_bounds = array<i64: 2, 128>}]} {
    %c0 = arith.constant 0 : index
    %c0_0 = arith.constant 0 : index
    %0 = vector.load %arg1[%c0, %c0_0] : memref<1x128xf32, #tpu.memory_space<vmem>>, vector<1x128xf32>
    %cst = arith.constant 0.000000e+00 : f32
    %1 = vector.broadcast %cst : f32 to vector<1x128xf32>
    %2 = arith.cmpf oge, %0, %1 : vector<1x128xf32>
    %cst_1 = arith.constant 0.00999999977 : f32
    %3 = vector.broadcast %cst_1 : f32 to vector<1x128xf32>
    %4 = arith.mulf %3, %0 : vector<1x128xf32>
    %5 = arith.select %2, %0, %4 : vector<1x128xi1>, vector<1x128xf32>
    %c0_2 = arith.constant 0 : index
    %c0_3 = arith.constant 0 : index
    %6 = vector.load %arg2[%c0_2, %c0_3] : memref<2x1xf32, #tpu.memory_space<vmem>>, vector<2x1xf32>
    %7 = vector.broadcast %5 : vector<1x128xf32> to vector<2x128xf32>
    %8 = vector.broadcast %6 : vector<2x1xf32> to vector<2x128xf32>
    %9 = arith.mulf %7, %8 : vector<2x128xf32>
    %c0_4 = arith.constant 0 : index
    %c0_5 = arith.constant 0 : index
    %10 = vector.load %arg3[%c0_4, %c0_5] : memref<2x1xf32, #tpu.memory_space<vmem>>, vector<2x1xf32>
    %11 = vector.broadcast %10 : vector<2x1xf32> to vector<2x128xf32>
    %12 = arith.addf %9, %11 : vector<2x128xf32>
    %cst_6 = arith.constant dense<0xFF800000> : vector<128xf32>
    %13 = vector.multi_reduction <maximumf>, %12, %cst_6 [0] : vector<2x128xf32> to vector<128xf32>
    %14 = vector.shape_cast %13 : vector<128xf32> to vector<1x128xf32>
    %15 = vector.broadcast %14 : vector<1x128xf32> to vector<2x128xf32>
    %16 = arith.subf %12, %15 : vector<2x128xf32>
    %17 = math.exp %16 : vector<2x128xf32>
    %cst_7 = arith.constant dense<0.000000e+00> : vector<128xf32>
    %18 = vector.multi_reduction <add>, %17, %cst_7 [0] : vector<2x128xf32> to vector<128xf32>
    %19 = vector.shape_cast %18 : vector<128xf32> to vector<1x128xf32>
    %20 = math.log %19 : vector<1x128xf32>
    %21 = vector.broadcast %20 : vector<1x128xf32> to vector<2x128xf32>
    %22 = arith.subf %16, %21 : vector<2x128xf32>
    %c0_8 = arith.constant 0 : index
    %c0_9 = arith.constant 0 : index
    %23 = vector.load %arg4[%c0_8, %c0_9] : memref<2x128xf32, #tpu.memory_space<vmem>>, vector<2x128xf32>
    tpu.vector_store %arg4[%c0_8, %c0_9], %22 {strides = array<i32>} : memref<2x128xf32, #tpu.memory_space<vmem>>, vector<2x128xf32>,
    return
  }
  func.func @transform_0(%arg0: i32) -> (i32, i32) {
    %c0_i32 = arith.constant 0 : i32
    %c0_i32_0 = arith.constant 0 : i32
    return %c0_i32, %arg0 : i32, i32
  }
  func.func @transform_1(%arg0: i32) -> (i32, i32) {
    %c0_i32 = arith.constant 0 : i32
    %c0_i32_0 = arith.constant 0 : i32
    %c0_i32_1 = arith.constant 0 : i32
    return %c0_i32, %c0_i32_0 : i32, i32
  }
  func.func @transform_2(%arg0: i32) -> (i32, i32) {
    %c0_i32 = arith.constant 0 : i32
    %c0_i32_0 = arith.constant 0 : i32
    %c0_i32_1 = arith.constant 0 : i32
    return %c0_i32, %c0_i32_0 : i32, i32
  }
  func.func @transform_3(%arg0: i32) -> (i32, i32) {
    %c0_i32 = arith.constant 0 : i32
    %c0_i32_0 = arith.constant 0 : i32
    return %c0_i32, %arg0 : i32, i32
  }
}

</mosaic_0001>

<bundles_post_ra>
// kernel: tpu_custom_call.1
= control target key start
LH: loop header
LB: loop body
LE: loop exit
PB: predicated region body
PF: predicated region fallthrough
CT: control target
= control target key end

     0   :  { %v106_v1 = vmov 0   ;;  %s149_s0 = inlined_call_operand.vmem [shape: f32[1,128], index: 0, kind: input, shape index: {}]   ;;  %s150_s1 = inlined_call_operand.vmem [shape: f32[2,1], index: 1, kind: input, shape index: {}]   ;;  %s151_s2 = inlined_call_operand.vmem [shape: f32[2,1], index: 2, kind: input, shape index: {}]   ;;  %s152_s3 = inlined_call_operand.hbm [shape: f32[2,128], index: 3, kind: output, shape index: {}]  }
   0x1   :  { %v19_v0 = vld [vmem:[%s150_s1] sm:$0x3]  ;;  %77 = vset.pattern.permute.xlu0 %v106_v1 }
   0x2   :  { %8 = vsyncpa [#allocation3], 0  ;;  %28 = vperm.xlu0 %77, %v19_v0   ;;  %v32_v2 = vld [vmem:[%s151_s2] sm:$0x3]  ;;  %v21_v3 = vlaneseq  ;;  %vm39_vm1 = vcmask 1041408  }
   0x3   :  { %v15_v4 = vld [vmem:[%s149_s0] sm:$0x1]  ;;  %s107_s0 = smov [#allocation2]  }
   0x4   :  { %v22_v5 = vshrl.u32 %v21_v3, 7  ;;  %v17_v6 = vmul.f32 0.01, %v15_v4  ;;  %vm16_vm0 = vcmp.ge.f32.partialorder %v15_v4, 0.0  ;;  %s67_s1 = sshll.u32 %s107_s0, 4  ;;  %s68_s1 = int_to_ptr.vmem [resolvable:$true] %s67_s1 }
   0x5   :  { %s82_s2 = scalar_lea.vmem %s68_s1, 32  ;;  %p87_p1 = scmp.lt.s32.totalorder %s68_s1, %s68_s1 }
   0x6   :  { %35 = vperm.xlu0 %77, %v32_v2   ;;  %v23_v7 = vsub.s32 0, %v22_v5  ;;  %v18_v8 = vsel %vm16_vm0, %v15_v4, %v17_v6  ;;  %p83_p0 = scmp.ne.s32.totalorder %s68_s1, %s82_s2  ;;  %p88_p2 = scmp.lt.s32.totalorder %s82_s2, %s82_s2 }
   0x8   :  { %v24_v9 = vrot.slane %v18_v8, %v23_v7  ;;  %p89_p3 = por %p88_p2, %p87_p1 }
   0xa   :  { %p90_p4 = pnand %p89_p3, %p83_p0 }
  0x81   :  { %v29_v10 = vpop.permute.xlu0 %28 }
  0x82   :  { %v31_v11 = vmul.f32 %v29_v10, %v24_v9 }
  0x85   :  { %v36_v12 = vpop.permute.xlu0 %35 }
  0x86   :  { %v38_v13 = vadd.f32 %v36_v12, %v31_v11 }
  0x88   :  { %v40_v14 = vsel %vm39_vm1, %v38_v13, -inf }
  0x89   :  { %v41_v15 = vrot.slane %v40_v14, 4 }
  0x8b   :  { %v42_v16 = vmax.f32 %v40_v14, %v41_v15 }
  0x8d   :  { %v43_v17 = vrot.slane %v42_v16, 2 }
  0x8f   :  { %v44_v18 = vmax.f32 %v42_v16, %v43_v17 }
  0x91   :  { %v45_v19 = vrot.slane %v44_v18, 1 }
  0x93   :  { %v46_v20 = vmax.f32 %v44_v18, %v45_v19 }
  0x95   :  { %v47_v21 = vsub.f32 %v38_v13, %v46_v20 }
  0x97   :  { %v48_v22 = vmul.f32 1.442695, %v47_v21 }
  0x99   :  { %78 = vpow2.f32 %v48_v22 }
  0xa3   :  { %v79_v23 = vpop.eup %78 }
  0xa4   :  { %v50_v24 = vsel %vm39_vm1, %v79_v23, 0.0 }
  0xa5   :  { %v51_v25 = vrot.slane %v50_v24, 4 }
  0xa7   :  { %v52_v26 = vadd.f32 %v51_v25, %v50_v24 }
  0xa9   :  { %v53_v27 = vrot.slane %v52_v26, 2 }
  0xab   :  { %v54_v28 = vadd.f32 %v53_v27, %v52_v26 }
  0xad   :  { %v55_v29 = vrot.slane %v54_v28, 1 }
  0xaf   :  { %v56_v30 = vadd.f32 %v55_v29, %v54_v28 }
  0xb1   :  { %80 = vlog2.f32 %v56_v30 }
  0xbb   :  { %v81_v31 = vpop.eup %80 }
  0xbc   :  { %v58_v32 = vmul.f32 0.6931472, %v81_v31 }
  0xbe   :  { %v59_v33 = vsub.f32 %v47_v21, %v58_v32 }
  0xc0   :  { %60 = vst [vmem:[#allocation2] sm:$0x3] %v59_v33 }
  0xc1   :  { %93 = shalt.err (!%p90_p4)
}
  0xc2   :  { %s94_s20 = scalar_lea.hbm %s152_s3, 32 }
  0xc3   :  { %p95_p5 = scmp.ne.s32.totalorder %s152_s3, %s94_s20  ;;  %p98_p6 = scmp.lt.u32.totalorder %s94_s20, %s152_s3 }
  0xc5   :  { %p100_p7 = pnand %p98_p6, %p95_p5 }
  0xc7   :  { %103 = shalt.err (!%p100_p7)
}
  0xc8   :  { %70 = dma.vmem_to_hbm [thread:$0]  %s68_s1, 32, %s152_s3, [#allocation3]  }
  0xc9   :  { %104 = dma.done.wait [#allocation3], 32  }
  0xca   :  { %105 = vsyncadd [#allocation3], 4294967264 }
  0xcb   :  { %74 = vsyncpa [#allocation3], 1 }

</bundles_post_ra>
